<compile_context>
chip_gen: v5e
topology: v5e:2x2
jax: 0.10.0
libtpu: 0.0.40
codegen_flags: <defaults>
</compile_context>

<pallas_src>
import math

import jax
import jax.numpy as jnp
from jax.experimental import pallas as pl
from jax.experimental.pallas import tpu as pltpu

# args.* hyper-parameters (deterministic, baked in at trace time)
EPS = 1e-8
LOG_EPS = math.log(EPS)
TAU = 0.5            # tau = 0.5 is exploited: softmax(f/tau) = e^2 / sum(e^2)
WORLD_SIZE = 1       # utils_ent.get_world_size() -> single-host synthetic run


def _recip(x):
    # EUP approximate reciprocal + one Newton-Raphson refinement step.
    # Operands are only (TB, 1) column vectors, so this is essentially free.
    r = pl.reciprocal(x, approx=True)
    return r * (2.0 - x * r)


def cmcd_kernel(x_ref, acc_ref, cs1_ref, cs2_ref):
    """x_ref: (2, TB, D) logits tile.  Outputs are per-shard accumulators:
       acc_ref/cs1_ref/cs2_ref: (1, 1, D) f32 resident across the tile axis."""
    i = pl.program_id(1)            # tile index within this shard (reduction axis)

    @pl.when(i == 0)
    def _init():
        acc_ref[...] = jnp.zeros_like(acc_ref)
        cs1_ref[...] = jnp.zeros_like(cs1_ref)
        cs2_ref[...] = jnp.zeros_like(cs2_ref)

    # TODO(synk): optional bf16 compute path (keep exp/products in bf16,
    # accumulate in f32) for bf16 inputs on v6e/v7x; f32 kept for parity.
    f1 = x_ref[0].astype(jnp.float32)          # (TB, D)
    f2 = x_ref[1].astype(jnp.float32)

    # Shifted logits; one exp per element per half (the only full-tile EUP op).
    z1 = f1 - jnp.max(f1, axis=-1, keepdims=True)
    z2 = f2 - jnp.max(f2, axis=-1, keepdims=True)
    e1 = jnp.exp(z1)
    e2 = jnp.exp(z2)

    # Row sums for the plain and the sharpened (tau = 0.5 => e*e) softmax.
    se1 = jnp.sum(e1, axis=-1, keepdims=True)          # (TB, 1)
    se2 = jnp.sum(e2, axis=-1, keepdims=True)
    q1 = e1 * e1
    q2 = e2 * e2
    sq1 = jnp.sum(q1, axis=-1, keepdims=True)
    sq2 = jnp.sum(q2, axis=-1, keepdims=True)

    p1 = e1 * _recip(se1)
    p2 = e2 * _recip(se2)
    s1 = q1 * _recip(sq1)
    s2 = q2 * _recip(sq2)

    # Analytic logs: only four per-row (TB,1) logs instead of full-tile logs.
    # Clamped at log(EPS) to mimic the reference's log(p + EPS) floor.
    lp1 = jnp.maximum(z1 - jnp.log(se1), LOG_EPS)
    lp2 = jnp.maximum(z2 - jnp.log(se2), LOG_EPS)
    ls1 = jnp.maximum(2.0 * z1 - jnp.log(sq1), LOG_EPS)
    ls2 = jnp.maximum(2.0 * z2 - jnp.log(sq2), LOG_EPS)

    # Fused contribution: sym-KL integrand minus both (negative) entropies.
    contrib = (p1 - p2) * (lp1 - lp2) - s1 * ls1 - s2 * ls2

    # Sublane-only (rows) reduction per tile; the cross-lane collapse and the
    # HE finalization happen once in the wrapper.
    acc_ref[...] += jnp.sum(contrib, axis=0, keepdims=True)[None]
    cs1_ref[...] += jnp.sum(s1, axis=0, keepdims=True)[None]
    cs2_ref[...] += jnp.sum(s2, axis=0, keepdims=True)[None]


def _pick_tile_rows(b, d, itemsize, row_mult):
    """Largest row-tile TB that divides B, is a multiple of `row_mult`, and keeps
    the per-tile resident VMEM (double-buffered input block + live f32
    intermediates) within ~28 MiB — safe for v7x's 64 MiB VMEM."""
    # input block: 2 halves x 2 buffers x TB x D x itemsize
    # live f32 temps: ~12 x TB x D x 4 bytes (z, e, q, p, s, lp/ls per half)
    bytes_per_row = d * (4 * itemsize + 12 * 4)
    budget = 28 * 1024 * 1024
    cap = min(1024, budget // max(bytes_per_row, 1), b)
    cap = (cap // row_mult) * row_mult
    for cand in range(cap, 0, -row_mult):
        if b % cand == 0:
            return cand
    # No row_mult-multiple divisor within budget: relax to any layout-legal
    # divisor (multiple of 8, or the full B for small/awkward shapes).
    for cand in range(min(cap, b), 0, -1):
        if b % cand == 0 and (cand % 8 == 0 or cand == b):
            return cand
    # TODO(synk): awkward large B with no budget-respecting divisor falls back
    # to a single full-B tile (may exceed the VMEM budget).
    return b


def cmcd_loss(inputs, targets=None, *, tile_rows=None):
    """inputs: [2*B, D] logits. targets unused (matches reference). Scalar loss."""
    del targets
    two_b, d = inputs.shape
    assert two_b % 2 == 0, "inputs must stack two views along dim 0"
    b = two_b // 2

    # (2, B, D) view: halves selected by the kernel's BlockSpec, not by XLA
    # slices in the wrapper (which would add a full extra HBM read+write).
    x = inputs.reshape(2, b, d)

    itemsize = jnp.dtype(inputs.dtype).itemsize
    row_mult = 16 if inputs.dtype == jnp.bfloat16 else 8
    tb = tile_rows if tile_rows is not None else _pick_tile_rows(b, d, itemsize, row_mult)
    assert b % tb == 0, f"tile_rows={tb} must divide B={b}"
    n_tiles = b // tb

    # Split the tile axis across TensorCores when possible (2x on v7x megacore;
    # a no-op on single-TC v5e/v6e).
    n_shards = 2 if (n_tiles % 2 == 0 and n_tiles >= 2) else 1
    tiles_per_shard = n_tiles // n_shards

    out_shape = jax.ShapeDtypeStruct((n_shards, 1, d), jnp.float32)
    out_spec = pl.BlockSpec((1, 1, d), lambda c, i: (c, 0, 0))

    acc_p, cs1_p, cs2_p = pl.pallas_call(
        cmcd_kernel,
        out_shape=(out_shape, out_shape, out_shape),
        grid_spec=pltpu.PrefetchScalarGridSpec(
            num_scalar_prefetch=0,
            grid=(n_shards, tiles_per_shard),
            in_specs=[pl.BlockSpec((2, tb, d),
                                   lambda c, i: (0, c * tiles_per_shard + i, 0))],
            out_specs=[out_spec, out_spec, out_spec],
        ),
        compiler_params=pltpu.CompilerParams(
            dimension_semantics=("parallel", "arbitrary"),
            vmem_limit_bytes=40 * 1024 * 1024,
        ),
    )(x)

    # Tiny finalization on combined partials (D-length work, negligible).
    inv_b = 1.0 / b
    acc_total = jnp.sum(acc_p)                       # sym-KL sum + EH sums over all rows
    m1 = jnp.sum(cs1_p, axis=(0, 1)) * inv_b         # column means of s1 / s2
    m2 = jnp.sum(cs2_p, axis=(0, 1)) * inv_b
    # sum(m * log(m + W*eps)) == -HE(m)
    s_he = (jnp.sum(m1 * jnp.log(m1 + WORLD_SIZE * EPS)) +
            jnp.sum(m2 * jnp.log(m2 + WORLD_SIZE * EPS)))
    # loss = 0.5*(sym_kl_sum + eh_sum)/B - 0.5*(HE1 + HE2)
    return 0.5 * (acc_total * inv_b + s_he)


def cmcd_loss_ref(inputs):
    """Pure-JAX reference for verification."""
    b = inputs.shape[0] // 2
    f1 = inputs[:b].astype(jnp.float32)
    f2 = inputs[b:].astype(jnp.float32)
    p1 = jax.nn.softmax(f1, axis=-1)
    p2 = jax.nn.softmax(f2, axis=-1)

    def kl(a, c):
        return jnp.mean(jnp.sum(a * jnp.log(a + EPS) - a * jnp.log(c + EPS), axis=1))

    loss_kl = 0.5 * (kl(p1, p2) + kl(p2, p1))
    s1 = jax.nn.softmax(f1 / TAU, axis=-1)
    s2 = jax.nn.softmax(f2 / TAU, axis=-1)

    def eh(p):
        return jnp.mean(-jnp.sum(p * jnp.log(p + EPS), axis=1))

    def he(p):
        m = jnp.mean(p, axis=0)
        return -jnp.sum(m * jnp.log(m + WORLD_SIZE * EPS))

    loss_eh = 0.5 * (eh(s1) + eh(s2))
    loss_he = 0.5 * (he(s1) + he(s2))
    return loss_kl + loss_eh - loss_he


if __name__ == "__main__":
    key = jax.random.PRNGKey(0)
    # 2*B rows of D-dim logits: B = 32 per half, D = 128 classes.
    inputs = jax.random.normal(key, (64, 128), dtype=jnp.float32)
    targets = jnp.zeros((64,), dtype=jnp.int32)   # unused (interface parity)

    ref = cmcd_loss_ref(inputs)

    # Auto tile size (single tile / single shard at this small shape).
    loss_auto = jax.block_until_ready(cmcd_loss(inputs, targets))
    # Forced small tile -> exercises multi-tile accumulation + 2-shard split.
    loss_tiled = jax.block_until_ready(cmcd_loss(inputs, targets, tile_rows=8))

    assert jnp.allclose(loss_auto, ref, rtol=5e-5, atol=5e-5), (loss_auto, ref)
    assert jnp.allclose(loss_tiled, ref, rtol=5e-5, atol=5e-5), (loss_tiled, ref)

    print("KERNEL_OK")
</pallas_src>

<mosaic_0001>
module attributes {stable_mosaic.version = 11 : i64} {
  func.func @cmcd_kernel(%arg0: i32, %arg1: i32, %arg2: memref<2x32x128xf32, #tpu.memory_space<vmem>>, %arg3: memref<1x1x128xf32, #tpu.memory_space<vmem>>, %arg4: memref<1x1x128xf32, #tpu.memory_space<vmem>>, %arg5: memref<1x1x128xf32, #tpu.memory_space<vmem>>) attributes {dimension_semantics = [#tpu.dimension_semantics<parallel>, #tpu.dimension_semantics<arbitrary>], iteration_bounds = array<i64: 1, 1>, scalar_prefetch = 0 : i64, scratch_operands = 0 : i64, tpu.core_type = #tpu.core_type<tc>, window_params = [{transform_indices = @transform_0, window_bounds = array<i64: 2, 32, 128>}, {transform_indices = @transform_1, window_bounds = array<i64: 1, 1, 128>}, {transform_indices = @transform_2, window_bounds = array<i64: 1, 1, 128>}, {transform_indices = @transform_3, window_bounds = array<i64: 1, 1, 128>}]} {
    %c0_i32 = arith.constant 0 : i32
    %0 = arith.cmpi eq, %arg1, %c0_i32 : i32
    %1 = arith.extui %0 : i1 to i32
    %c0_i32_0 = arith.constant 0 : i32
    %2 = arith.cmpi ne, %1, %c0_i32_0 : i32
    scf.if %2 {
      %cst_41 = arith.constant 0.000000e+00 : f32
      %104 = vector.broadcast %cst_41 : f32 to vector<1x1x128xf32>
      %c0_42 = arith.constant 0 : index
      %c0_43 = arith.constant 0 : index
      %c0_44 = arith.constant 0 : index
      %105 = vector.load %arg3[%c0_42, %c0_43, %c0_44] : memref<1x1x128xf32, #tpu.memory_space<vmem>>, vector<1x1x128xf32>
      tpu.vector_store %arg3[%c0_42, %c0_43, %c0_44], %104 {strides = array<i32>} : memref<1x1x128xf32, #tpu.memory_space<vmem>>, vector<1x1x128xf32>,
      %cst_45 = arith.constant 0.000000e+00 : f32
      %106 = vector.broadcast %cst_45 : f32 to vector<1x1x128xf32>
      %c0_46 = arith.constant 0 : index
      %c0_47 = arith.constant 0 : index
      %c0_48 = arith.constant 0 : index
      %107 = vector.load %arg4[%c0_46, %c0_47, %c0_48] : memref<1x1x128xf32, #tpu.memory_space<vmem>>, vector<1x1x128xf32>
      tpu.vector_store %arg4[%c0_46, %c0_47, %c0_48], %106 {strides = array<i32>} : memref<1x1x128xf32, #tpu.memory_space<vmem>>, vector<1x1x128xf32>,
      %cst_49 = arith.constant 0.000000e+00 : f32
      %108 = vector.broadcast %cst_49 : f32 to vector<1x1x128xf32>
      %c0_50 = arith.constant 0 : index
      %c0_51 = arith.constant 0 : index
      %c0_52 = arith.constant 0 : index
      %109 = vector.load %arg5[%c0_50, %c0_51, %c0_52] : memref<1x1x128xf32, #tpu.memory_space<vmem>>, vector<1x1x128xf32>
      tpu.vector_store %arg5[%c0_50, %c0_51, %c0_52], %108 {strides = array<i32>} : memref<1x1x128xf32, #tpu.memory_space<vmem>>, vector<1x1x128xf32>,
    } else {
    }
    %c0 = arith.constant 0 : index
    %c0_1 = arith.constant 0 : index
    %c0_2 = arith.constant 0 : index
    %3 = vector.load %arg2[%c0, %c0_1, %c0_2] : memref<2x32x128xf32, #tpu.memory_space<vmem>>, vector<1x32x128xf32>
    %4 = vector.shape_cast %3 : vector<1x32x128xf32> to vector<32x128xf32>
    %c1 = arith.constant 1 : index
    %c0_3 = arith.constant 0 : index
    %c0_4 = arith.constant 0 : index
    %5 = vector.load %arg2[%c1, %c0_3, %c0_4] : memref<2x32x128xf32, #tpu.memory_space<vmem>>, vector<1x32x128xf32>
    %6 = vector.shape_cast %5 : vector<1x32x128xf32> to vector<32x128xf32>
    %cst = arith.constant dense<0xFF800000> : vector<32xf32>
    %7 = vector.multi_reduction <maximumf>, %4, %cst [1] : vector<32x128xf32> to vector<32xf32>
    %8 = vector.shape_cast %7 : vector<32xf32> to vector<32x1xf32>
    %9 = vector.broadcast %8 : vector<32x1xf32> to vector<32x128xf32>
    %10 = arith.subf %4, %9 : vector<32x128xf32>
    %cst_5 = arith.constant dense<0xFF800000> : vector<32xf32>
    %11 = vector.multi_reduction <maximumf>, %6, %cst_5 [1] : vector<32x128xf32> to vector<32xf32>
    %12 = vector.shape_cast %11 : vector<32xf32> to vector<32x1xf32>
    %13 = vector.broadcast %12 : vector<32x1xf32> to vector<32x128xf32>
    %14 = arith.subf %6, %13 : vector<32x128xf32>
    %15 = math.exp %10 : vector<32x128xf32>
    %16 = math.exp %14 : vector<32x128xf32>
    %cst_6 = arith.constant dense<0.000000e+00> : vector<32xf32>
    %17 = vector.multi_reduction <add>, %15, %cst_6 [1] : vector<32x128xf32> to vector<32xf32>
    %18 = vector.shape_cast %17 : vector<32xf32> to vector<32x1xf32>
    %cst_7 = arith.constant dense<0.000000e+00> : vector<32xf32>
    %19 = vector.multi_reduction <add>, %16, %cst_7 [1] : vector<32x128xf32> to vector<32xf32>
    %20 = vector.shape_cast %19 : vector<32xf32> to vector<32x1xf32>
    %21 = arith.mulf %15, %15 : vector<32x128xf32>
    %22 = arith.mulf %16, %16 : vector<32x128xf32>
    %cst_8 = arith.constant dense<0.000000e+00> : vector<32xf32>
    %23 = vector.multi_reduction <add>, %21, %cst_8 [1] : vector<32x128xf32> to vector<32xf32>
    %24 = vector.shape_cast %23 : vector<32xf32> to vector<32x1xf32>
    %cst_9 = arith.constant dense<0.000000e+00> : vector<32xf32>
    %25 = vector.multi_reduction <add>, %22, %cst_9 [1] : vector<32x128xf32> to vector<32xf32>
    %26 = vector.shape_cast %25 : vector<32xf32> to vector<32x1xf32>
    %27 = tpu.reciprocal %18 {approx = true} : vector<32x1xf32> -> vector<32x1xf32>
    %28 = arith.mulf %18, %27 : vector<32x1xf32>
    %cst_10 = arith.constant 2.000000e+00 : f32
    %29 = vector.broadcast %cst_10 : f32 to vector<32x1xf32>
    %30 = arith.subf %29, %28 : vector<32x1xf32>
    %31 = arith.mulf %27, %30 : vector<32x1xf32>
    %32 = vector.broadcast %31 : vector<32x1xf32> to vector<32x128xf32>
    %33 = arith.mulf %15, %32 : vector<32x128xf32>
    %34 = tpu.reciprocal %20 {approx = true} : vector<32x1xf32> -> vector<32x1xf32>
    %35 = arith.mulf %20, %34 : vector<32x1xf32>
    %cst_11 = arith.constant 2.000000e+00 : f32
    %36 = vector.broadcast %cst_11 : f32 to vector<32x1xf32>
    %37 = arith.subf %36, %35 : vector<32x1xf32>
    %38 = arith.mulf %34, %37 : vector<32x1xf32>
    %39 = vector.broadcast %38 : vector<32x1xf32> to vector<32x128xf32>
    %40 = arith.mulf %16, %39 : vector<32x128xf32>
    %41 = tpu.reciprocal %24 {approx = true} : vector<32x1xf32> -> vector<32x1xf32>
    %42 = arith.mulf %24, %41 : vector<32x1xf32>
    %cst_12 = arith.constant 2.000000e+00 : f32
    %43 = vector.broadcast %cst_12 : f32 to vector<32x1xf32>
    %44 = arith.subf %43, %42 : vector<32x1xf32>
    %45 = arith.mulf %41, %44 : vector<32x1xf32>
    %46 = vector.broadcast %45 : vector<32x1xf32> to vector<32x128xf32>
    %47 = arith.mulf %21, %46 : vector<32x128xf32>
    %48 = tpu.reciprocal %26 {approx = true} : vector<32x1xf32> -> vector<32x1xf32>
    %49 = arith.mulf %26, %48 : vector<32x1xf32>
    %cst_13 = arith.constant 2.000000e+00 : f32
    %50 = vector.broadcast %cst_13 : f32 to vector<32x1xf32>
    %51 = arith.subf %50, %49 : vector<32x1xf32>
    %52 = arith.mulf %48, %51 : vector<32x1xf32>
    %53 = vector.broadcast %52 : vector<32x1xf32> to vector<32x128xf32>
    %54 = arith.mulf %22, %53 : vector<32x128xf32>
    %55 = math.log %18 : vector<32x1xf32>
    %56 = vector.broadcast %55 : vector<32x1xf32> to vector<32x128xf32>
    %57 = arith.subf %10, %56 : vector<32x128xf32>
    %cst_14 = arith.constant -18.420681 : f32
    %58 = vector.broadcast %cst_14 : f32 to vector<32x128xf32>
    %59 = arith.maximumf %57, %58 : vector<32x128xf32>
    %60 = math.log %20 : vector<32x1xf32>
    %61 = vector.broadcast %60 : vector<32x1xf32> to vector<32x128xf32>
    %62 = arith.subf %14, %61 : vector<32x128xf32>
    %cst_15 = arith.constant -18.420681 : f32
    %63 = vector.broadcast %cst_15 : f32 to vector<32x128xf32>
    %64 = arith.maximumf %62, %63 : vector<32x128xf32>
    %cst_16 = arith.constant 2.000000e+00 : f32
    %65 = vector.broadcast %cst_16 : f32 to vector<32x128xf32>
    %66 = arith.mulf %65, %10 : vector<32x128xf32>
    %67 = math.log %24 : vector<32x1xf32>
    %68 = vector.broadcast %67 : vector<32x1xf32> to vector<32x128xf32>
    %69 = arith.subf %66, %68 : vector<32x128xf32>
    %cst_17 = arith.constant -18.420681 : f32
    %70 = vector.broadcast %cst_17 : f32 to vector<32x128xf32>
    %71 = arith.maximumf %69, %70 : vector<32x128xf32>
    %cst_18 = arith.constant 2.000000e+00 : f32
    %72 = vector.broadcast %cst_18 : f32 to vector<32x128xf32>
    %73 = arith.mulf %72, %14 : vector<32x128xf32>
    %74 = math.log %26 : vector<32x1xf32>
    %75 = vector.broadcast %74 : vector<32x1xf32> to vector<32x128xf32>
    %76 = arith.subf %73, %75 : vector<32x128xf32>
    %cst_19 = arith.constant -18.420681 : f32
    %77 = vector.broadcast %cst_19 : f32 to vector<32x128xf32>
    %78 = arith.maximumf %76, %77 : vector<32x128xf32>
    %79 = arith.subf %33, %40 : vector<32x128xf32>
    %80 = arith.subf %59, %64 : vector<32x128xf32>
    %81 = arith.mulf %79, %80 : vector<32x128xf32>
    %82 = arith.mulf %47, %71 : vector<32x128xf32>
    %83 = arith.subf %81, %82 : vector<32x128xf32>
    %84 = arith.mulf %54, %78 : vector<32x128xf32>
    %85 = arith.subf %83, %84 : vector<32x128xf32>
    %c0_20 = arith.constant 0 : index
    %c0_21 = arith.constant 0 : index
    %c0_22 = arith.constant 0 : index
    %86 = vector.load %arg3[%c0_20, %c0_21, %c0_22] : memref<1x1x128xf32, #tpu.memory_space<vmem>>, vector<1x1x128xf32>
    %cst_23 = arith.constant dense<0.000000e+00> : vector<128xf32>
    %87 = vector.multi_reduction <add>, %85, %cst_23 [0] : vector<32x128xf32> to vector<128xf32>
    %88 = vector.shape_cast %87 : vector<128xf32> to vector<1x128xf32>
    %89 = vector.shape_cast %88 : vector<1x128xf32> to vector<1x1x128xf32>
    %90 = arith.addf %86, %89 : vector<1x1x128xf32>
    %c0_24 = arith.constant 0 : index
    %c0_25 = arith.constant 0 : index
    %c0_26 = arith.constant 0 : index
    %91 = vector.load %arg3[%c0_24, %c0_25, %c0_26] : memref<1x1x128xf32, #tpu.memory_space<vmem>>, vector<1x1x128xf32>
    tpu.vector_store %arg3[%c0_24, %c0_25, %c0_26], %90 {strides = array<i32>} : memref<1x1x128xf32, #tpu.memory_space<vmem>>, vector<1x1x128xf32>,
    %c0_27 = arith.constant 0 : index
    %c0_28 = arith.constant 0 : index
    %c0_29 = arith.constant 0 : index
    %92 = vector.load %arg4[%c0_27, %c0_28, %c0_29] : memref<1x1x128xf32, #tpu.memory_space<vmem>>, vector<1x1x128xf32>
    %cst_30 = arith.constant dense<0.000000e+00> : vector<128xf32>
    %93 = vector.multi_reduction <add>, %47, %cst_30 [0] : vector<32x128xf32> to vector<128xf32>
    %94 = vector.shape_cast %93 : vector<128xf32> to vector<1x128xf32>
    %95 = vector.shape_cast %94 : vector<1x128xf32> to vector<1x1x128xf32>
    %96 = arith.addf %92, %95 : vector<1x1x128xf32>
    %c0_31 = arith.constant 0 : index
    %c0_32 = arith.constant 0 : index
    %c0_33 = arith.constant 0 : index
    %97 = vector.load %arg4[%c0_31, %c0_32, %c0_33] : memref<1x1x128xf32, #tpu.memory_space<vmem>>, vector<1x1x128xf32>
    tpu.vector_store %arg4[%c0_31, %c0_32, %c0_33], %96 {strides = array<i32>} : memref<1x1x128xf32, #tpu.memory_space<vmem>>, vector<1x1x128xf32>,
    %c0_34 = arith.constant 0 : index
    %c0_35 = arith.constant 0 : index
    %c0_36 = arith.constant 0 : index
    %98 = vector.load %arg5[%c0_34, %c0_35, %c0_36] : memref<1x1x128xf32, #tpu.memory_space<vmem>>, vector<1x1x128xf32>
    %cst_37 = arith.constant dense<0.000000e+00> : vector<128xf32>
    %99 = vector.multi_reduction <add>, %54, %cst_37 [0] : vector<32x128xf32> to vector<128xf32>
    %100 = vector.shape_cast %99 : vector<128xf32> to vector<1x128xf32>
    %101 = vector.shape_cast %100 : vector<1x128xf32> to vector<1x1x128xf32>
    %102 = arith.addf %98, %101 : vector<1x1x128xf32>
    %c0_38 = arith.constant 0 : index
    %c0_39 = arith.constant 0 : index
    %c0_40 = arith.constant 0 : index
    %103 = vector.load %arg5[%c0_38, %c0_39, %c0_40] : memref<1x1x128xf32, #tpu.memory_space<vmem>>, vector<1x1x128xf32>
    tpu.vector_store %arg5[%c0_38, %c0_39, %c0_40], %102 {strides = array<i32>} : memref<1x1x128xf32, #tpu.memory_space<vmem>>, vector<1x1x128xf32>,
    return
  }
  func.func @transform_0(%arg0: i32, %arg1: i32) -> (i32, i32, i32) {
    %c1_i32 = arith.constant 1 : i32
    %0 = arith.muli %arg0, %c1_i32 : i32
    %1 = arith.addi %0, %arg1 : i32
    %c0_i32 = arith.constant 0 : i32
    %c0_i32_0 = arith.constant 0 : i32
    %c0_i32_1 = arith.constant 0 : i32
    return %c0_i32, %1, %c0_i32_0 : i32, i32, i32
  }
  func.func @transform_1(%arg0: i32, %arg1: i32) -> (i32, i32, i32) {
    %c0_i32 = arith.constant 0 : i32
    %c0_i32_0 = arith.constant 0 : i32
    %c0_i32_1 = arith.constant 0 : i32
    return %arg0, %c0_i32, %c0_i32_0 : i32, i32, i32
  }
  func.func @transform_2(%arg0: i32, %arg1: i32) -> (i32, i32, i32) {
    %c0_i32 = arith.constant 0 : i32
    %c0_i32_0 = arith.constant 0 : i32
    %c0_i32_1 = arith.constant 0 : i32
    return %arg0, %c0_i32, %c0_i32_0 : i32, i32, i32
  }
  func.func @transform_3(%arg0: i32, %arg1: i32) -> (i32, i32, i32) {
    %c0_i32 = arith.constant 0 : i32
    %c0_i32_0 = arith.constant 0 : i32
    %c0_i32_1 = arith.constant 0 : i32
    return %arg0, %c0_i32, %c0_i32_0 : i32, i32, i32
  }
}

</mosaic_0001>

<bundles_post_ra>
// kernel: tpu_custom_call.1
= control target key start
LH: loop header
LB: loop body
LE: loop exit
PB: predicated region body
PF: predicated region fallthrough
CT: control target
= control target key end

     0   :  { %9 = vsyncpa [#allocation3], 0  ;;  %s808_s0 = inlined_call_operand.hbm [shape: f32[2,32,128], index: 0, kind: input, shape index: {}]   ;;  %s809_s1 = inlined_call_operand.hbm [shape: f32[1,1,128], index: 1, kind: output, shape index: {0}]   ;;  %s810_s2 = inlined_call_operand.hbm [shape: f32[1,1,128], index: 2, kind: output, shape index: {1}]   ;;  %s811_s3 = inlined_call_operand.hbm [shape: f32[1,1,128], index: 3, kind: output, shape index: {2}]  }
   0x1   :  { %10 = vsyncpa [#allocation4], 0 }
   0x2   :  { %11 = vsyncpa [#allocation7], 0  ;;  %s20_s14 = sshll.u32 %s808_s0, 4  ;;  %s584_s15 = smov [#allocation2]   ;;  %s21_s14 = int_to_ptr.hbm [resolvable:$true] %s20_s14 }
   0x3   :  { %s22_s16 = sshll.u32 %s584_s15, 4  ;;  %s585_s17 = smov 128   ;;  %s23_s16 = int_to_ptr.vmem [resolvable:$true] %s22_s16 }
   0x4   :  { %s586_s18 = smov 8  }
   0x5   :  { %28 = dma.hbm_to_vmem [thread:$0]  %s21_s14, 1024, %s23_s16, [#allocation3], %s585_s17, %s585_s17, %s586_s18  }
   0x6   :  { %578 = dma.done.wait [#allocation3], 1024  }
   0x7   :  { %579 = vsyncadd [#allocation3], 4294966272  ;;  %v47_v0 = vld [vmem:[#allocation2 + $0x20] sm:$0xff]  ;;  %v44_v1 = vld [vmem:[#allocation2 + $0x10] sm:$0xff]  ;;  %s588_s0 = smov [#allocation6]   ;;  %s365_s22 = sshll.u32 %s810_s2, 4  ;;  %s366_s22 = int_to_ptr.hbm [resolvable:$true] %s365_s22 }
   0x8   :  { %v42_v2 = vld [vmem:[#allocation2] sm:$0xff]  ;;  %63 = vmax.xlane.f32.xlu1 %v47_v0  ;;  %55 = vmax.xlane.f32.xlu2 %v44_v1  ;;  %v48_v3 = vld [vmem:[#allocation2 + $0x28] sm:$0xff]  ;;  %v49_v4 = vld [vmem:[#allocation2 + $0x30] sm:$0xff]  ;;  %s363_s19 = sshll.u32 %s588_s0, 4  ;;  %s589_s23 = smov [#allocation8]   ;;  %s364_s19 = int_to_ptr.vmem [resolvable:$true] %s363_s19 }
   0x9   :  { %51 = vmax.xlane.f32.xlu0 %v42_v2  ;;  %v43_v5 = vld [vmem:[#allocation2 + $0x8] sm:$0xff]  ;;  %v50_v6 = vld [vmem:[#allocation2 + $0x38] sm:$0xff]  ;;  %s374_s24 = sshll.u32 %s589_s23, 4  ;;  %s376_s27 = sshll.u32 %s811_s3, 4  ;;  %s375_s24 = int_to_ptr.vmem [resolvable:$true] %s374_s24  ;;  %s377_s27 = int_to_ptr.hbm [resolvable:$true] %s376_s27 }
   0xa   :  { %v45_v7 = vld [vmem:[#allocation2 + $0x18] sm:$0xff]  ;;  %s590_s28 = smov [#allocation5]   ;;  %s354_s4 = sshll.u32 %s809_s1, 4  ;;  %s355_s4 = int_to_ptr.hbm [resolvable:$true] %s354_s4 }
   0xb   :  { %s352_s2 = sshll.u32 %s590_s28, 4  ;;  %s353_s2 = int_to_ptr.vmem [resolvable:$true] %s352_s2 }
  0x10   :  { %65 = vmax.xlane.f32.xlu1 %v48_v3  ;;  %67 = vmax.xlane.f32.xlu2 %v49_v4 }
  0x11   :  { %53 = vmax.xlane.f32.xlu0 %v43_v5 }
  0x18   :  { %69 = vmax.xlane.f32.xlu1 %v50_v6 }
  0x19   :  { %57 = vmax.xlane.f32.xlu0 %v45_v7 }
  0x7b   :  { %v64_v8 = vpop.xlane.xlu1 %63  ;;  %v56_v9 = vpop.xlane.xlu2 %55 }
  0x7c   :  { %v614_v10 = vsub.f32 %v47_v0, %v64_v8  ;;  %v52_v11 = vpop.xlane.xlu0 %51  ;;  %v635_v26 = vsub.f32 %v44_v1, %v56_v9 }
  0x7d   :  { %v616_v12 = vsub.f32 %v42_v2, %v52_v11 }
  0x7e   :  { %v83_v13 = vmul.f32 1.442695, %v614_v10  ;;  %v79_v32 = vmul.f32 1.442695, %v635_v26 }
  0x7f   :  { %v75_v14 = vmul.f32 1.442695, %v616_v12 }
  0x80   :  { %402 = vpow2.f32 %v83_v13  ;;  %v709_v13 = vmul.f32 2.0, %v616_v12 }
  0x81   :  { %404 = vpow2.f32 %v75_v14 }
  0x83   :  { %v66_v15 = vpop.xlane.xlu1 %65  ;;  %v68_v16 = vpop.xlane.xlu2 %67 }
  0x84   :  { %v620_v17 = vsub.f32 %v48_v3, %v66_v15  ;;  %v622_v18 = vsub.f32 %v49_v4, %v68_v16  ;;  %v54_v19 = vpop.xlane.xlu0 %53  ;;  %v703_v4 = vmul.f32 2.0, %v614_v10 }
  0x85   :  { %v624_v20 = vsub.f32 %v43_v5, %v54_v19 }
  0x86   :  { %v626_v21 = vpop.eup %402  ;;  %v85_v22 = vmul.f32 1.442695, %v620_v17  ;;  %v87_v23 = vmul.f32 1.442695, %v622_v18  ;;  %v713_v16 = vmul.f32 2.0, %v620_v17  ;;  %v716_v19 = vmul.f32 2.0, %v622_v18 }
  0x87   :  { %v77_v24 = vmul.f32 1.442695, %v624_v20  ;;  %99 = vadd.xlane.f32.xlu1 %v626_v21  ;;  %v632_v25 = vpop.eup %404  ;;  %v664_v40 = vmul.f32 %v626_v21, %v626_v21 }
  0x88   :  { %406 = vpow2.f32 %v85_v22  ;;  %91 = vadd.xlane.f32.xlu2 %v632_v25  ;;  %v668_v41 = vmul.f32 %v632_v25, %v632_v25 }
  0x89   :  { %408 = vpow2.f32 %v87_v23 }
  0x8a   :  { %410 = vpow2.f32 %v77_v24 }
  0x8b   :  { %v70_v27 = vpop.xlane.xlu1 %69 }
  0x8c   :  { %v637_v28 = vsub.f32 %v50_v6, %v70_v27  ;;  %v58_v29 = vpop.xlane.xlu0 %57 }
  0x8d   :  { %v639_v30 = vsub.f32 %v45_v7, %v58_v29  ;;  %v706_v7 = vmul.f32 2.0, %v635_v26 }
  0x8e   :  { %v641_v31 = vpop.eup %406  ;;  %v89_v33 = vmul.f32 1.442695, %v637_v28 }
  0x8f   :  { %v645_v34 = vpop.eup %408  ;;  %v81_v35 = vmul.f32 1.442695, %v639_v30  ;;  %v683_v44 = vmul.f32 %v641_v31, %v641_v31 }
  0x90   :  { %v648_v36 = vpop.eup %410  ;;  %412 = vpow2.f32 %v89_v33  ;;  %103 = vadd.xlane.f32.xlu1 %v645_v34  ;;  %101 = vadd.xlane.f32.xlu2 %v641_v31  ;;  %v679_v43 = vmul.f32 %v645_v34, %v645_v34 }
  0x91   :  { %414 = vpow2.f32 %v81_v35  ;;  %93 = vadd.xlane.f32.xlu0 %v648_v36  ;;  %v672_v42 = vmul.f32 %v648_v36, %v648_v36  ;;  %v719_v35 = vmul.f32 2.0, %v624_v20 }
  0x92   :  { %416 = vpow2.f32 %v79_v32 }
  0x96   :  { %v653_v37 = vpop.eup %412 }
  0x97   :  { %v655_v38 = vpop.eup %414  ;;  %v694_v46 = vmul.f32 %v653_v37, %v653_v37 }
  0x98   :  { %v657_v39 = vpop.eup %416  ;;  %97 = vadd.xlane.f32.xlu1 %v655_v38  ;;  %105 = vadd.xlane.f32.xlu2 %v653_v37  ;;  %v698_v47 = vmul.f32 %v655_v38, %v655_v38 }
  0x99   :  { %95 = vadd.xlane.f32.xlu0 %v657_v39  ;;  %v687_v45 = vmul.f32 %v657_v39, %v657_v39 }
  0xa0   :  { %123 = vadd.xlane.f32.xlu1 %v664_v40  ;;  %115 = vadd.xlane.f32.xlu2 %v668_v41 }
  0xa1   :  { %117 = vadd.xlane.f32.xlu0 %v672_v42 }
  0xa8   :  { %127 = vadd.xlane.f32.xlu1 %v679_v43  ;;  %125 = vadd.xlane.f32.xlu2 %v683_v44 }
  0xa9   :  { %119 = vadd.xlane.f32.xlu0 %v687_v45 }
  0xb0   :  { %129 = vadd.xlane.f32.xlu2 %v694_v46 }
  0xb1   :  { %121 = vadd.xlane.f32.xlu0 %v698_v47 }
  0xfa   :  { %v100_v48 = vpop.xlane.xlu1 %99 }
  0xfb   :  { %v92_v49 = vpop.xlane.xlu2 %91  ;;  %418 = vrcp.f32 %v100_v48 }
  0xfc   :  { %420 = vrcp.f32 %v92_v49 }
  0xfd   :  { %422 = vlog2.f32 %v100_v48 }
  0xfe   :  { %424 = vlog2.f32 %v92_v49 }
 0x101   :  { %v419_v53 = vpop.eup %418 }
 0x102   :  { %v421_v54 = vpop.eup %420  ;;  %v155_v56 = vmul.f32 %v419_v53, %v100_v48 }
 0x103   :  { %v104_v50 = vpop.xlane.xlu1 %103  ;;  %v102_v51 = vpop.xlane.xlu2 %101  ;;  %v135_v57 = vmul.f32 %v421_v54, %v92_v49 }
 0x104   :  { %v94_v52 = vpop.xlane.xlu0 %93  ;;  %426 = vrcp.f32 %v102_v51  ;;  %v423_v55 = vpop.eup %422  ;;  %v159_v1 = vsub.f32 2.0, %v155_v56 }
 0x105   :  { %428 = vlog2.f32 %v102_v51  ;;  %v425_v58 = vpop.eup %424  ;;  %v228_v61 = vmul.f32 0.6931472, %v423_v55  ;;  %v139_v5 = vsub.f32 2.0, %v135_v57 }
 0x106   :  { %430 = vrcp.f32 %v94_v52  ;;  %v212_v8 = vmul.f32 0.6931472, %v425_v58  ;;  %v163_v22 = vmul.f32 %v419_v53, %v159_v1 }
 0x107   :  { %432 = vlog2.f32 %v94_v52  ;;  %v235_v14 = vsub.f32 %v614_v10, %v228_v61  ;;  %v143_v27 = vmul.f32 %v421_v54, %v139_v5  ;;  %v722_v10 = vmul.f32 2.0, %v637_v28 }
 0x108   :  { %434 = vrcp.f32 %v104_v50  ;;  %v219_v48 = vsub.f32 %v616_v12, %v212_v8  ;;  %v167_v61 = vmul.f32 %v626_v21, %v163_v22 }
 0x109   :  { %v239_v55 = vmax.f32 %v235_v14, -18.420681  ;;  %v147_v5 = vmul.f32 %v632_v25, %v143_v27 }
 0x10a   :  { %v427_v60 = vpop.eup %426 }
 0x10b   :  { %v98_v59 = vpop.xlane.xlu1 %97  ;;  %v106_v62 = vpop.xlane.xlu2 %105  ;;  %v156_v2 = vmul.f32 %v427_v60, %v102_v51 }
 0x10c   :  { %436 = vrcp.f32 %v98_v59  ;;  %v96_v63 = vpop.xlane.xlu0 %95  ;;  %v429_v0 = vpop.eup %428 }
 0x10d   :  { %438 = vrcp.f32 %v106_v62  ;;  %v431_v3 = vpop.eup %430  ;;  %v160_v15 = vsub.f32 2.0, %v156_v2  ;;  %v230_v29 = vmul.f32 0.6931472, %v429_v0 }
 0x10e   :  { %440 = vlog2.f32 %v104_v50  ;;  %v433_v6 = vpop.eup %432  ;;  %v136_v9 = vmul.f32 %v431_v3, %v94_v52 }
 0x10f   :  { %442 = vlog2.f32 %v106_v62  ;;  %v435_v11 = vpop.eup %434  ;;  %v214_v32 = vmul.f32 0.6931472, %v433_v6  ;;  %v164_v53 = vmul.f32 %v427_v60, %v160_v15  ;;  %v236_v12 = vsub.f32 %v620_v17, %v230_v29 }
 0x110   :  { %444 = vrcp.f32 %v96_v63  ;;  %v140_v23 = vsub.f32 2.0, %v136_v9  ;;  %v157_v49 = vmul.f32 %v435_v11, %v104_v50  ;;  %v732_v60 = vmul.f32 2.0, %v639_v30 }
 0x111   :  { %446 = vlog2.f32 %v98_v59  ;;  %v220_v50 = vsub.f32 %v624_v20, %v214_v32  ;;  %v168_v21 = vmul.f32 %v641_v31, %v164_v53  ;;  %v283_v20 = vsub.f32 %v147_v5, %v167_v61 }
 0x112   :  { %v437_v24 = vpop.eup %436  ;;  %v144_v56 = vmul.f32 %v431_v3, %v140_v23  ;;  %v223_v3 = vmax.f32 %v219_v48, -18.420681  ;;  %v161_v6 = vsub.f32 2.0, %v157_v49  ;;  %v240_v22 = vmax.f32 %v236_v12, -18.420681 }
 0x113   :  { %v439_v33 = vpop.eup %438  ;;  %v124_v51 = vpop.xlane.xlu1 %123  ;;  %v138_v1 = vmul.f32 %v437_v24, %v98_v59  ;;  %v224_v23 = vmax.f32 %v220_v50, -18.420681 }
 0x114   :  { %v441_v52 = vpop.eup %440  ;;  %v116_v57 = vpop.xlane.xlu2 %115  ;;  %448 = vrcp.f32 %v124_v51  ;;  %v158_v0 = vmul.f32 %v439_v33, %v106_v62  ;;  %v148_v59 = vmul.f32 %v648_v36, %v144_v56  ;;  %v165_v29 = vmul.f32 %v435_v11, %v161_v6 }
 0x115   :  { %v725_v54 = vpop.xlane.xlu0 %117  ;;  %v443_v58 = vpop.eup %442  ;;  %450 = vrcp.f32 %v116_v57  ;;  %v232_v8 = vmul.f32 0.6931472, %v441_v52  ;;  %v142_v25 = vsub.f32 2.0, %v138_v1  ;;  %v287_v48 = vsub.f32 %v223_v3, %v239_v55 }
 0x116   :  { %v445_v2 = vpop.eup %444  ;;  %452 = vlog2.f32 %v96_v63  ;;  %v234_v62 = vmul.f32 0.6931472, %v443_v58  ;;  %v162_v14 = vsub.f32 2.0, %v158_v0  ;;  %v284_v49 = vsub.f32 %v148_v59, %v168_v21 }
 0x117   :  { %v447_v9 = vpop.eup %446  ;;  %454 = vlog2.f32 %v116_v57  ;;  %v137_v15 = vmul.f32 %v445_v2, %v96_v63  ;;  %v237_v32 = vsub.f32 %v622_v18, %v232_v8  ;;  %v146_v61 = vmul.f32 %v437_v24, %v142_v25 }
 0x118   :  { %456 = vlog2.f32 %v124_v51  ;;  %v218_v31 = vmul.f32 0.6931472, %v447_v9  ;;  %v238_v63 = vsub.f32 %v637_v28, %v234_v62  ;;  %v166_v58 = vmul.f32 %v439_v33, %v162_v14 }
 0x119   :  { %458 = vrcp.f32 %v725_v54  ;;  %v141_v0 = vsub.f32 2.0, %v137_v15  ;;  %v744_v5 = vmul.f32 %v287_v48, %v283_v20  ;;  %v288_v18 = vsub.f32 %v224_v23, %v240_v22 }
 0x11a   :  { %v736_v17 = vpop.eup %448  ;;  %460 = vlog2.f32 %v725_v54  ;;  %v748_v50 = vmul.f32 %v645_v34, %v165_v29  ;;  %v750_v28 = vmax.f32 %v237_v32, -18.420681  ;;  %v756_v9 = vmul.f32 %v653_v37, %v166_v58 }
 0x11b   :  { %v451_v27 = vpop.eup %450  ;;  %v128_v1 = vpop.xlane.xlu1 %127  ;;  %v195_v12 = vmul.f32 %v736_v17, %v124_v51  ;;  %v753_v3 = vmul.f32 %v288_v18, %v284_v49  ;;  %v758_v51 = vmax.f32 %v238_v63, -18.420681  ;;  %v761_v21 = vmul.f32 %v655_v38, %v146_v61 }
 0x11c   :  { %v453_v36 = vpop.eup %452  ;;  %v175_v52 = vmul.f32 %v451_v27, %v116_v57  ;;  %v126_v53 = vpop.xlane.xlu2 %125  ;;  %v222_v57 = vsub.f32 %v639_v30, %v218_v31  ;;  %v145_v34 = vmul.f32 %v445_v2, %v141_v0  ;;  %v587_v59 = vmov 0.0  }
 0x11d   :  { %v742_v56 = vpop.xlane.xlu0 %119  ;;  %462 = vrcp.f32 %v126_v53  ;;  %v455_v11 = vpop.eup %454  ;;  %v216_v33 = vmul.f32 0.6931472, %v453_v36  ;;  %40 = vst [vmem:[#allocation6] sm:$0x1] %v587_v59  ;;  %v199_v30 = vsub.f32 2.0, %v195_v12 }
 0x11e   :  { %464 = vlog2.f32 %v126_v53  ;;  %v457_v55 = vpop.eup %456  ;;  %v179_v6 = vsub.f32 2.0, %v175_v52  ;;  %v248_v62 = vmul.f32 0.6931472, %v455_v11  ;;  %39 = vst [vmem:[#allocation5] sm:$0x1] %v587_v59  ;;  %v149_v31 = vmul.f32 %v657_v39, %v145_v34 }
 0x11f   :  { %v459_v24 = vpop.eup %458  ;;  %466 = vrcp.f32 %v128_v1  ;;  %v764_v15 = vmax.f32 %v222_v57, -18.420681  ;;  %v221_v37 = vsub.f32 %v635_v26, %v216_v33  ;;  %41 = vst [vmem:[#allocation8] sm:$0x1] %v587_v59  ;;  %v268_v2 = vmul.f32 0.6931472, %v457_v55 }
 0x120   :  { %v461_v8 = vpop.eup %460  ;;  %v176_v14 = vmul.f32 %v459_v24, %v725_v54  ;;  %468 = vlog2.f32 %v128_v1  ;;  %v183_v22 = vmul.f32 %v451_v27, %v179_v6  ;;  %v286_v54 = vsub.f32 %v761_v21, %v756_v9 }
 0x121   :  { %v250_v20 = vmul.f32 0.6931472, %v461_v8  ;;  %470 = vrcp.f32 %v742_v56  ;;  %v255_v26 = vsub.f32 %v709_v13, %v248_v62  ;;  %v203_v49 = vmul.f32 %v736_v17, %v199_v30 }
 0x122   :  { %v180_v23 = vsub.f32 2.0, %v176_v14  ;;  %472 = vlog2.f32 %v742_v56  ;;  %v225_v58 = vmax.f32 %v221_v37, -18.420681  ;;  %v187_v11 = vmul.f32 %v183_v22, %v668_v41 }
 0x123   :  { %v463_v25 = vpop.eup %462  ;;  %v275_v39 = vsub.f32 %v703_v4, %v268_v2  ;;  %v285_v57 = vsub.f32 %v149_v31, %v748_v50  ;;  %v259_v33 = vmax.f32 %v255_v26, -18.420681 }
 0x124   :  { %v465_v38 = vpop.eup %464  ;;  %v196_v29 = vmul.f32 %v463_v25, %v126_v53  ;;  %v130_v32 = vpop.xlane.xlu2 %129  ;;  %v184_v63 = vmul.f32 %v459_v24, %v180_v23  ;;  %v256_v53 = vsub.f32 %v719_v35, %v250_v20  ;;  %v207_v35 = vmul.f32 %v203_v49, %v664_v40 }
 0x125   :  { %v270_v36 = vmul.f32 0.6931472, %v465_v38  ;;  %v467_v48 = vpop.eup %466  ;;  %v122_v27 = vpop.xlane.xlu0 %121  ;;  %474 = vrcp.f32 %v130_v32  ;;  %v289_v8 = vsub.f32 %v225_v58, %v750_v28  ;;  %v279_v34 = vmax.f32 %v275_v39, -18.420681 }
 0x126   :  { %v200_v52 = vsub.f32 2.0, %v196_v29  ;;  %v197_v61 = vmul.f32 %v467_v48, %v128_v1  ;;  %v469_v0 = vpop.eup %468  ;;  %476 = vlog2.f32 %v130_v32  ;;  %v188_v13 = vmul.f32 %v184_v63, %v672_v42 }
 0x127   :  { %v471_v12 = vpop.eup %470  ;;  %v276_v17 = vsub.f32 %v713_v16, %v270_v36  ;;  %478 = vrcp.f32 %v122_v27  ;;  %v260_v41 = vmax.f32 %v256_v53, -18.420681  ;;  %v272_v6 = vmul.f32 0.6931472, %v469_v0 }
 0x128   :  { %v204_v18 = vmul.f32 %v463_v25, %v200_v52  ;;  %v201_v55 = vsub.f32 2.0, %v197_v61  ;;  %v177_v1 = vmul.f32 %v471_v12, %v742_v56  ;;  %v473_v24 = vpop.eup %472  ;;  %480 = vlog2.f32 %v122_v27 }
 0x129   :  { %v295_v42 = vmul.f32 %v259_v33, %v187_v11  ;;  %v296_v62 = vmul.f32 %v260_v41, %v188_v13  ;;  %v280_v30 = vmax.f32 %v276_v17, -18.420681  ;;  %v252_v14 = vmul.f32 0.6931472, %v473_v24 }
 0x12a   :  { %v208_v4 = vmul.f32 %v204_v18, %v683_v44  ;;  %v181_v16 = vsub.f32 2.0, %v177_v1  ;;  %v205_v50 = vmul.f32 %v467_v48, %v201_v55  ;;  %v293_v40 = vmul.f32 %v289_v8, %v285_v57 }
 0x12b   :  { %v475_v59 = vpop.eup %474  ;;  %v303_v37 = vmul.f32 %v279_v34, %v207_v35  ;;  %v277_v44 = vsub.f32 %v716_v19, %v272_v6  ;;  %v257_v2 = vsub.f32 %v706_v7, %v252_v14  ;;  %v299_v48 = vsub.f32 %v744_v5, %v295_v42 }
 0x12c   :  { %v477_v25 = vpop.eup %476  ;;  %v185_v56 = vmul.f32 %v471_v12, %v181_v16  ;;  %v198_v20 = vmul.f32 %v475_v59, %v130_v32  ;;  %v304_v22 = vmul.f32 %v280_v30, %v208_v4  ;;  %v336_v23 = vadd.f32 %v208_v4, %v207_v35 }
 0x12d   :  { %v479_v38 = vpop.eup %478  ;;  %v274_v28 = vmul.f32 0.6931472, %v477_v25  ;;  %v300_v49 = vsub.f32 %v753_v3, %v296_v62  ;;  %v209_v63 = vmul.f32 %v205_v50, %v679_v43  ;;  %v261_v32 = vmax.f32 %v257_v2, -18.420681  ;;  %v323_v25 = vld [vmem:[#allocation6] sm:$0x1] }
 0x12e   :  { %v189_v29 = vmul.f32 %v185_v56, %v687_v45  ;;  %v202_v31 = vsub.f32 2.0, %v198_v20  ;;  %v178_v36 = vmul.f32 %v479_v38, %v122_v27  ;;  %v481_v26 = vpop.eup %480  ;;  %v324_v52 = vadd.f32 %v188_v13, %v187_v11 }
 0x12f   :  { %v254_v19 = vmul.f32 0.6931472, %v481_v26  ;;  %v308_v61 = vsub.f32 %v300_v49, %v304_v22  ;;  %v281_v7 = vmax.f32 %v277_v44, -18.420681  ;;  %v278_v39 = vsub.f32 %v722_v10, %v274_v28  ;;  %v311_v44 = vld [vmem:[#allocation5] sm:$0x1] }
 0x130   :  { %v206_v58 = vmul.f32 %v475_v59, %v202_v31  ;;  %v182_v53 = vsub.f32 2.0, %v178_v36  ;;  %v297_v0 = vmul.f32 %v261_v32, %v189_v29  ;;  %v337_v45 = vadd.f32 %v336_v23, %v209_v63 }
 0x131   :  { %v258_v5 = vsub.f32 %v732_v60, %v254_v19  ;;  %v290_v3 = vsub.f32 %v764_v15, %v758_v51  ;;  %v307_v43 = vsub.f32 %v299_v48, %v303_v37  ;;  %v305_v12 = vmul.f32 %v281_v7, %v209_v63 }
 0x132   :  { %v210_v27 = vmul.f32 %v206_v58, %v694_v46  ;;  %v186_v18 = vmul.f32 %v479_v38, %v182_v53  ;;  %v301_v11 = vsub.f32 %v293_v40, %v297_v0  ;;  %v325_v13 = vadd.f32 %v324_v52, %v189_v29 }
 0x133   :  { %v262_v57 = vmax.f32 %v258_v5, -18.420681  ;;  %v294_v10 = vmul.f32 %v290_v3, %v286_v54  ;;  %v312_v33 = vadd.f32 %v308_v61, %v307_v43  ;;  %v282_v46 = vmax.f32 %v278_v39, -18.420681  ;;  %v335_v54 = vld [vmem:[#allocation8] sm:$0x1] }
 0x134   :  { %v338_v17 = vadd.f32 %v337_v45, %v210_v27  ;;  %v190_v55 = vmul.f32 %v186_v18, %v698_v47  ;;  %v309_v35 = vsub.f32 %v301_v11, %v305_v12 }
 0x135   :  { %v306_v41 = vmul.f32 %v282_v46, %v210_v27 }
 0x136   :  { %v339_v1 = vrot.slane %v338_v17, 4  ;;  %v298_v60 = vmul.f32 %v262_v57, %v190_v55  ;;  %v326_v24 = vadd.f32 %v325_v13, %v190_v55  ;;  %v313_v6 = vadd.f32 %v312_v33, %v309_v35 }
 0x138   :  { %v340_v51 = vadd.f32 %v339_v1, %v338_v17  ;;  %v302_v15 = vsub.f32 %v294_v10, %v298_v60  ;;  %v327_v4 = vrot.slane %v326_v24, 4 }
 0x13a   :  { %v341_v8 = vrot.slane %v340_v51, 2  ;;  %v310_v42 = vsub.f32 %v302_v15, %v306_v41  ;;  %v328_v34 = vadd.f32 %v327_v4, %v326_v24 }
 0x13c   :  { %v342_v47 = vadd.f32 %v341_v8, %v340_v51  ;;  %v314_v16 = vadd.f32 %v313_v6, %v310_v42  ;;  %v329_v59 = vrot.slane %v328_v34, 2 }
 0x13e   :  { %v343_v62 = vrot.slane %v342_v47, 1  ;;  %v315_v9 = vrot.slane %v314_v16, 4  ;;  %v330_v21 = vadd.f32 %v329_v59, %v328_v34 }
 0x140   :  { %v331_v30 = vrot.slane %v330_v21, 1  ;;  %v316_v50 = vadd.f32 %v315_v9, %v314_v16  ;;  %v344_v14 = vadd.f32 %v343_v62, %v342_v47 }
 0x142   :  { %v332_v40 = vadd.f32 %v331_v30, %v330_v21  ;;  %v317_v37 = vrot.slane %v316_v50, 2  ;;  %v345_v56 = vadd.f32 %v344_v14, %v335_v54 }
 0x144   :  { %v333_v20 = vadd.f32 %v332_v40, %v323_v25  ;;  %v318_v38 = vadd.f32 %v317_v37, %v316_v50  ;;  %346 = vst [vmem:[#allocation8] sm:$0x1] %v345_v56 }
 0x146   :  { %334 = vst [vmem:[#allocation6] sm:$0x1] %v333_v20  ;;  %v319_v22 = vrot.slane %v318_v38, 1 }
 0x147   :  { %368 = dma.vmem_to_hbm [thread:$0]  %s364_s19, 16, %s366_s22, [#allocation7]  }
 0x148   :  { %v320_v2 = vadd.f32 %v319_v22, %v318_v38  ;;  %379 = dma.vmem_to_hbm [thread:$0]  %s375_s24, 16, %s377_s27, [#allocation7]  }
 0x14a   :  { %v321_v28 = vadd.f32 %v320_v2, %v311_v44 }
 0x14c   :  { %322 = vst [vmem:[#allocation5] sm:$0x1] %v321_v28 }
 0x14d   :  { %357 = dma.vmem_to_hbm [thread:$0]  %s353_s2, 16, %s355_s4, [#allocation4]  }
 0x14e   :  { %580 = dma.done.wait [#allocation4], 16  }
 0x14f   :  { %581 = vsyncadd [#allocation4], 4294967280 }
 0x150   :  { %582 = dma.done.wait [#allocation7], 32  }
 0x151   :  { %583 = vsyncadd [#allocation7], 4294967264 }
 0x152   :  { %392 = vsyncpa [#allocation3], 1 }
 0x153   :  { %393 = vsyncpa [#allocation4], 1 }
 0x154   :  { %394 = vsyncpa [#allocation7], 1 }

</bundles_post_ra>
